<compile_context>
chip_gen: v7x
topology: tpu7x:2x2x1
jax: 0.10.0
libtpu: 0.0.40
codegen_flags: <defaults>
</compile_context>

<pallas_src>
import functools

import jax
import jax.numpy as jnp
from jax.experimental import pallas as pl
from jax.experimental.pallas import tpu as pltpu


# ---------------------------------------------------------------------------
# Pallas kernel: single-pass matmul with fused bias + activation epilogue.
#   a_ref: (R, K)  b_ref: (K, TC)  bias_ref: (R, 1) or (1, TC)  o_ref: (R, TC)
# K is never tiled, so there is no accumulator carry / init / finalize.
# ---------------------------------------------------------------------------
def _matmul_bias_act_kernel(a_ref, b_ref, bias_ref, o_ref, *, activation):
    y = jnp.dot(a_ref[...], b_ref[...], preferred_element_type=jnp.float32)
    y = y + bias_ref[...].astype(jnp.float32)
    if activation == "relu":
        y = jnp.maximum(y, 0.0)
    elif activation == "sigmoid":
        y = jax.nn.sigmoid(y)
    # activation == "none": identity
    o_ref[...] = y.astype(o_ref.dtype)


def _pick_col_tile(c):
    if c >= 2048 and c % 1024 == 0:
        return 1024
    if c >= 1024 and c % 512 == 0:
        return 512  # keeps >=2 parallel grid steps (v7x megacore)
    return c        # block == full dim (exempt from the 8x128 rule)


def matmul_bias_act(a, b, bias, activation="none", out_dtype=jnp.float32):
    """act(a @ b + bias).  a:(R,K), b:(K,C), bias:(R,1) or (1,C)."""
    R, K = a.shape
    K2, C = b.shape
    assert K == K2, (K, K2)
    tc = _pick_col_tile(C)
    assert C % tc == 0

    if bias.shape == (R, 1):
        bias_spec = pl.BlockSpec((R, 1), lambda i: (0, 0))
    elif bias.shape == (1, C):
        bias_spec = pl.BlockSpec((1, tc), lambda i: (0, i))
    else:
        raise ValueError(f"bad bias shape {bias.shape}")

    kernel = functools.partial(_matmul_bias_act_kernel, activation=activation)
    return pl.pallas_call(
        kernel,
        out_shape=jax.ShapeDtypeStruct((R, C), out_dtype),
        grid_spec=pltpu.PrefetchScalarGridSpec(
            num_scalar_prefetch=0,
            grid=(C // tc,),
            in_specs=[
                pl.BlockSpec((R, K), lambda i: (0, 0)),   # weights / small lhs
                pl.BlockSpec((K, tc), lambda i: (0, i)),  # patch-matrix columns
                bias_spec,
            ],
            out_specs=pl.BlockSpec((R, tc), lambda i: (0, i)),
        ),
        compiler_params=pltpu.CompilerParams(
            dimension_semantics=("parallel",),
        ),
    )(a, b, bias.astype(jnp.float32))


# ---------------------------------------------------------------------------
# Conv2d on CNHW activations: im2col (no transposes) + one fused Pallas matmul.
# ---------------------------------------------------------------------------
def conv2d_cnhw(x, w, b, stride, pad, activation, out_dtype=jnp.bfloat16):
    """x: (C_in, B, H, W); w: (C_out, C_in, k, k) [PyTorch Conv2d layout];
    b: (C_out,).  Returns (C_out, B, Ho, Wo)."""
    C_in, B, H, W = x.shape
    C_out, _, k, _ = w.shape
    Ho = (H + 2 * pad - k) // stride + 1
    Wo = (W + 2 * pad - k) // stride + 1
    xp = jnp.pad(x, ((0, 0), (0, 0), (pad, pad), (pad, pad)))
    taps = [
        xp[:, :, dy:dy + stride * (Ho - 1) + 1:stride,
                 dx:dx + stride * (Wo - 1) + 1:stride]
        for dy in range(k) for dx in range(k)
    ]
    cols = jnp.stack(taps, axis=0).reshape(k * k * C_in, B * Ho * Wo)
    amat = w.transpose(0, 2, 3, 1).reshape(C_out, k * k * C_in).astype(x.dtype)
    out = matmul_bias_act(amat, cols, b.reshape(C_out, 1), activation, out_dtype)
    return out.reshape(C_out, B, Ho, Wo)


# ---------------------------------------------------------------------------
# ConvTranspose2d(k=4, s=2, p=1) via sub-pixel decomposition.
# Output phase (py, px) at location (m, n):
#   y[2m+py, 2n+px] = sum_{dy,dx,ci} x[ci, m+dy-1, n+dx-1]
#                                     * w[ci, co, TAP[py][dy], TAP[px][dx]]
# where TAP[0] = (3, 1, -), TAP[1] = (-, 2, 0)   ("-" = structural zero).
# ---------------------------------------------------------------------------
_PHASE_TAPS = ((3, 1, -1), (-1, 2, 0))


def _deconv_phase_weight(w):
    """w: (C_in, C_out, 4, 4) ConvTranspose2d weight -> (4*C_out, 9*C_in)."""
    C_in, C_out, k, _ = w.shape
    assert k == 4
    amat = jnp.zeros((2, 2, C_out, 3, 3, C_in), w.dtype)
    for py in range(2):
        for px in range(2):
            for dy in range(3):
                kh = _PHASE_TAPS[py][dy]
                if kh < 0:
                    continue
                for dx in range(3):
                    kw = _PHASE_TAPS[px][dx]
                    if kw < 0:
                        continue
                    amat = amat.at[py, px, :, dy, dx, :].set(w[:, :, kh, kw].T)
    return amat.reshape(4 * C_out, 9 * C_in)


def conv_transpose2d_cnhw(x, w, b, activation, out_dtype=jnp.bfloat16):
    """x: (C_in, B, H, W); w: (C_in, C_out, 4, 4) [PyTorch ConvTranspose2d];
    b: (C_out,).  stride=2, padding=1.  Returns (C_out, B, 2H, 2W)."""
    C_in, B, H, W = x.shape
    _, C_out, k, _ = w.shape
    assert k == 4
    xp = jnp.pad(x, ((0, 0), (0, 0), (1, 1), (1, 1)))
    taps = [xp[:, :, dy:dy + H, dx:dx + W] for dy in range(3) for dx in range(3)]
    cols = jnp.stack(taps, axis=0).reshape(9 * C_in, B * H * W)
    amat = _deconv_phase_weight(w).astype(x.dtype)          # (4*C_out, 9*C_in)
    bias = jnp.tile(b, 4).reshape(4 * C_out, 1)
    out = matmul_bias_act(amat, cols, bias, activation, out_dtype)  # (4*C_out, M)
    out = out.reshape(2, 2, C_out, B, H, W).transpose(2, 3, 4, 0, 5, 1)
    return out.reshape(C_out, B, 2 * H, 2 * W)               # pixel-shuffle


# ---------------------------------------------------------------------------
# BaseAE parameters + forward.
# ---------------------------------------------------------------------------
def init_params(key, nbr_input_channels=3, reshape_channels=4, latent_dim=32):
    dim_before_fc = 64 * reshape_channels * reshape_channels
    keys = jax.random.split(key, 20)
    s = 0.05

    def w(i, shape):
        return jax.random.normal(keys[i], shape, jnp.float32) * s

    def bvec(i, n):
        return jax.random.normal(keys[i], (n,), jnp.float32) * s

    return {
        # encoder (stride-2 mirror of the decoder)
        "enc_w1": w(0, (32, nbr_input_channels, 4, 4)), "enc_b1": bvec(1, 32),
        "enc_w2": w(2, (32, 32, 4, 4)),                 "enc_b2": bvec(3, 32),
        "enc_w3": w(4, (64, 32, 4, 4)),                 "enc_b3": bvec(5, 64),
        "enc_w4": w(6, (64, 64, 4, 4)),                 "enc_b4": bvec(7, 64),
        "enc_fc_w": w(8, (dim_before_fc, latent_dim)),  "enc_fc_b": bvec(9, latent_dim),
        # decoder (exactly `_define_decoder` + Linear(latent -> dim_before_fc))
        "dec_fc_w": w(10, (latent_dim, dim_before_fc)), "dec_fc_b": bvec(11, dim_before_fc),
        "dec_w1": w(12, (64, 64, 4, 4)),                "dec_b1": bvec(13, 64),
        "dec_w2": w(14, (64, 32, 4, 4)),                "dec_b2": bvec(15, 32),
        "dec_w3": w(16, (32, 32, 4, 4)),                "dec_b3": bvec(17, 32),
        "dec_w4": w(18, (32, nbr_input_channels, 4, 4)),"dec_b4": bvec(19, nbr_input_channels),
    }


def base_ae_forward(params, x, reshape_channels=4):
    B = x.shape[0]
    cdt = jnp.bfloat16   # MXU operand / intermediate-activation dtype

    # ---- encode -> mu ----
    h = x.transpose(1, 0, 2, 3).astype(cdt)                  # NCHW -> CNHW (once)
    h = conv2d_cnhw(h, params["enc_w1"], params["enc_b1"], 2, 1, "relu", cdt)
    h = conv2d_cnhw(h, params["enc_w2"], params["enc_b2"], 2, 1, "relu", cdt)
    h = conv2d_cnhw(h, params["enc_w3"], params["enc_b3"], 2, 1, "relu", cdt)
    h = conv2d_cnhw(h, params["enc_w4"], params["enc_b4"], 2, 1, "relu", cdt)
    hf = h.transpose(1, 0, 2, 3).reshape(B, -1)              # PyTorch NCHW flatten
    mu = matmul_bias_act(hf, params["enc_fc_w"].astype(cdt),
                         params["enc_fc_b"].reshape(1, -1), "none", jnp.float32)

    # ---- decode -> xhat ----
    d = matmul_bias_act(mu.astype(cdt), params["dec_fc_w"].astype(cdt),
                        params["dec_fc_b"].reshape(1, -1), "relu", cdt)
    d = d.reshape(B, 64, reshape_channels, reshape_channels).transpose(1, 0, 2, 3)
    d = conv_transpose2d_cnhw(d, params["dec_w1"], params["dec_b1"], "relu", cdt)
    d = conv_transpose2d_cnhw(d, params["dec_w2"], params["dec_b2"], "relu", cdt)
    d = conv_transpose2d_cnhw(d, params["dec_w3"], params["dec_b3"], "relu", cdt)
    xhat = conv_transpose2d_cnhw(d, params["dec_w4"], params["dec_b4"],
                                 "sigmoid", jnp.float32)
    return {"xhat": xhat.transpose(1, 0, 2, 3), "mu": mu}    # CNHW -> NCHW (once)


# ---------------------------------------------------------------------------
# Pure-lax references (validation only, not part of the hot path).
# ---------------------------------------------------------------------------
def _conv2d_ref_nchw(x, w, b, stride, pad):
    y = jax.lax.conv_general_dilated(
        x, w, window_strides=(stride, stride),
        padding=[(pad, pad), (pad, pad)],
        dimension_numbers=("NCHW", "OIHW", "NCHW"))
    return y + b.reshape(1, -1, 1, 1)


def _conv_transpose2d_ref_nchw(x, w, b, stride, pad):
    k = w.shape[-1]
    w_conv = jnp.flip(w, (2, 3)).transpose(1, 0, 2, 3)       # (C_out, C_in, k, k)
    y = jax.lax.conv_general_dilated(
        x, w_conv, window_strides=(1, 1),
        padding=[(k - 1 - pad, k - 1 - pad)] * 2,
        lhs_dilation=(stride, stride),
        dimension_numbers=("NCHW", "OIHW", "NCHW"))
    return y + b.reshape(1, -1, 1, 1)


if __name__ == "__main__":
    key = jax.random.PRNGKey(0)
    k_param, k_x, k_c = jax.random.split(key, 3)

    # --- sanity check the Pallas conv / sub-pixel deconv lowerings (f32) ---
    kc = jax.random.split(k_c, 4)
    xt = jax.random.normal(kc[0], (2, 3, 16, 16), jnp.float32)           # NCHW
    wc = jax.random.normal(kc[1], (8, 3, 4, 4), jnp.float32) * 0.1
    wd = jax.random.normal(kc[2], (3, 8, 4, 4), jnp.float32) * 0.1
    bb = jax.random.normal(kc[3], (8,), jnp.float32) * 0.1
    xt_c = xt.transpose(1, 0, 2, 3)                                       # CNHW
    got_c = conv2d_cnhw(xt_c, wc, bb, 2, 1, "none",
                        jnp.float32).transpose(1, 0, 2, 3)
    got_d = conv_transpose2d_cnhw(xt_c, wd, bb, "none",
                                  jnp.float32).transpose(1, 0, 2, 3)
    assert jnp.allclose(got_c, _conv2d_ref_nchw(xt, wc, bb, 2, 1),
                        rtol=5e-2, atol=5e-2)
    assert jnp.allclose(got_d, _conv_transpose2d_ref_nchw(xt, wd, bb, 2, 1),
                        rtol=5e-2, atol=5e-2)

    # --- BaseAE forward: mpi3d config (3 channels, 64x64 images, latent 32) ---
    params = init_params(k_param, nbr_input_channels=3, reshape_channels=4,
                         latent_dim=32)
    x = jax.random.uniform(k_x, (2, 3, 64, 64), jnp.float32)              # NCHW

    fwd = jax.jit(functools.partial(base_ae_forward, reshape_channels=4))
    out = fwd(params, x)
    jax.block_until_ready(out)

    assert out["xhat"].shape == (2, 3, 64, 64), out["xhat"].shape
    assert out["mu"].shape == (2, 32), out["mu"].shape
    assert bool(jnp.all(jnp.isfinite(out["xhat"])))
    assert bool(jnp.all((out["xhat"] >= 0.0) & (out["xhat"] <= 1.0)))  # Sigmoid range
    print("KERNEL_OK")
</pallas_src>

<mosaic_0001>
module attributes {stable_mosaic.version = 11 : i64} {
  func.func @_matmul_bias_act_kernel(%arg0: i32, %arg1: memref<8x48xf32, #tpu.memory_space<vmem>>, %arg2: memref<48x128xf32, #tpu.memory_space<vmem>>, %arg3: memref<8x1xf32, #tpu.memory_space<vmem>>, %arg4: memref<8x128xf32, #tpu.memory_space<vmem>>) attributes {dimension_semantics = [#tpu.dimension_semantics<parallel>], iteration_bounds = array<i64: 1>, scalar_prefetch = 0 : i64, scratch_operands = 0 : i64, tpu.core_type = #tpu.core_type<tc>, window_params = [{pipeline_mode = #tpu.pipeline_mode<synchronous>, transform_indices = @transform_0, window_bounds = array<i64: 8, 48>}, {transform_indices = @transform_1, window_bounds = array<i64: 48, 128>}, {pipeline_mode = #tpu.pipeline_mode<synchronous>, transform_indices = @transform_2, window_bounds = array<i64: 8, 1>}, {transform_indices = @transform_3, window_bounds = array<i64: 8, 128>}]} {
    %c0 = arith.constant 0 : index
    %c0_0 = arith.constant 0 : index
    %0 = vector.load %arg1[%c0, %c0_0] : memref<8x48xf32, #tpu.memory_space<vmem>>, vector<8x48xf32>
    %c0_1 = arith.constant 0 : index
    %c0_2 = arith.constant 0 : index
    %1 = vector.load %arg2[%c0_1, %c0_2] : memref<48x128xf32, #tpu.memory_space<vmem>>, vector<48x128xf32>
    %cst = arith.constant dense<0.000000e+00> : vector<8x128xf32>
    %2 = tpu.matmul %0, %1, %cst {dimension_numbers = #tpu.dot_dimension_numbers<[1], [0], [0], [1], [0, 0, 1, 1], [], []>} : vector<8x48xf32>, vector<48x128xf32>, vector<8x128xf32> -> vector<8x128xf32>
    %c0_3 = arith.constant 0 : index
    %c0_4 = arith.constant 0 : index
    %3 = vector.load %arg3[%c0_3, %c0_4] : memref<8x1xf32, #tpu.memory_space<vmem>>, vector<8x1xf32>
    %4 = vector.broadcast %3 : vector<8x1xf32> to vector<8x128xf32>
    %5 = arith.addf %2, %4 : vector<8x128xf32>
    %c0_5 = arith.constant 0 : index
    %c0_6 = arith.constant 0 : index
    %6 = vector.load %arg4[%c0_5, %c0_6] : memref<8x128xf32, #tpu.memory_space<vmem>>, vector<8x128xf32>
    tpu.vector_store %arg4[%c0_5, %c0_6], %5 {strides = array<i32>} : memref<8x128xf32, #tpu.memory_space<vmem>>, vector<8x128xf32>,
    return
  }
  func.func @transform_0(%arg0: i32) -> (i32, i32) {
    %c0_i32 = arith.constant 0 : i32
    %c0_i32_0 = arith.constant 0 : i32
    %c0_i32_1 = arith.constant 0 : i32
    return %c0_i32, %c0_i32_0 : i32, i32
  }
  func.func @transform_1(%arg0: i32) -> (i32, i32) {
    %c0_i32 = arith.constant 0 : i32
    %c0_i32_0 = arith.constant 0 : i32
    return %c0_i32, %arg0 : i32, i32
  }
  func.func @transform_2(%arg0: i32) -> (i32, i32) {
    %c0_i32 = arith.constant 0 : i32
    %c0_i32_0 = arith.constant 0 : i32
    %c0_i32_1 = arith.constant 0 : i32
    return %c0_i32, %c0_i32_0 : i32, i32
  }
  func.func @transform_3(%arg0: i32) -> (i32, i32) {
    %c0_i32 = arith.constant 0 : i32
    %c0_i32_0 = arith.constant 0 : i32
    return %c0_i32, %arg0 : i32, i32
  }
}

</mosaic_0001>

<bundles_post_ra>
// kernel: tpu_custom_call.1
= control target key start
LH: loop header
LB: loop body
LE: loop exit
PB: predicated region body
PF: predicated region fallthrough
CT: control target
= control target key end

     0   :  { %8 = vsyncpa [#allocation3], 0  ;;  %s279_s0 = inlined_call_operand.vmem [shape: f32[8,48], index: 0, kind: input, shape index: {}]   ;;  %s280_s1 = inlined_call_operand.hbm [shape: f32[48,128], index: 1, kind: input, shape index: {}]   ;;  %s281_s2 = inlined_call_operand.vmem [shape: f32[8,1], index: 2, kind: input, shape index: {}]   ;;  %s282_s3 = inlined_call_operand.hbm [shape: f32[8,128], index: 3, kind: output, shape index: {}]  }
   0x1   :  { %9 = vsyncpa [#allocation4], 0  ;;  %s221_s12 = smov [#allocation2]   ;;  %s173_s16 = scalar_lea.hbm %s280_s1, 768 }
   0x2   :  { %s17_s13 = sshll.u32 %s221_s12, 4  ;;  %p174_p0 = scmp.ne.s32.totalorder %s280_s1, %s173_s16  ;;  %s18_s13 = int_to_ptr.vmem [resolvable:$true] %s17_s13 }
   0x3   :  { %p177_p1 = scmp.lt.u32.totalorder %s173_s16, %s280_s1 }
   0x5   :  { %p179_p2 = pnand %p177_p1, %p174_p0 }
   0x7   :  { %182 = shalt.err (!%p179_p2)
}
   0x8   :  { %s183_s21 = scalar_lea.vmem %s18_s13, 768  ;;  %p188_p4 = scmp.lt.s32.totalorder %s18_s13, %s18_s13 }
   0x9   :  { %p184_p3 = scmp.ne.s32.totalorder %s18_s13, %s183_s21  ;;  %p189_p5 = scmp.lt.s32.totalorder %s183_s21, %s183_s21 }
   0xb   :  { %p190_p6 = por %p189_p5, %p188_p4 }
   0xd   :  { %p191_p7 = pnand %p190_p6, %p184_p3 }
   0xf   :  { %194 = shalt.err (!%p191_p7)
}
  0x10   :  { %s222_s22 = smov 128   ;;  %s223_s23 = smov 8  }
  0x11   :  { %23 = dma.hbm_to_vmem [thread:$0]  %s280_s1, 768, %s18_s13, [#allocation3], %s222_s22, %s222_s22, %s223_s23  }
  0x12   :  { %217 = dma.done.wait [#allocation3], 768  }
  0x13   :  { %218 = vsyncadd [#allocation3], 4294966528  ;;  %v224_v0 = vmov 0.0|0.0   ;;  %vm225_vm0 = vmmov 0   ;;  %v226_v1 = vmov 0.0   ;;  %v227_v2 = vmov 0  }
  0x14   :  { %155 = vmatprep.subr.bf16.mxu0 %v224_v0  ;;  %152 = vmatprep.mubr.msk.f32.mxu0 %vm225_vm0, %v226_v1  ;;  %v30_v3 = vld [vmem:[#allocation2] sm:$0xff]  ;;  %v31_v4 = vld [vmem:[#allocation2 + $0x8] sm:$0xff]  ;;  %v32_v5 = vld [vmem:[#allocation2 + $0x10] sm:$0xff]  ;;  %vm42_vm1 = vcmask 392192   ;;  %s228_s29 = smov [#allocation5]  }
  0x15   :  { %172 = vset.pattern.permute.xlu0 %v227_v2  ;;  %v156_v6 = vpack.c.bf16 %v31_v4, %v30_v3  ;;  %v33_v7 = vld [vmem:[#allocation2 + $0x18] sm:$0xff]  ;;  %v36_v8 = vld [vmem:[%s281_s2] sm:$0xff]  ;;  %v35_v11 = vld [vmem:[#allocation2 + $0x28] sm:$0xff]  ;;  %s123_s30 = sshll.u32 %s228_s29, 4  ;;  %s124_s30 = int_to_ptr.vmem [resolvable:$true] %s123_s30 }
  0x16   :  { %v159_v9 = vpack.c.bf16 %v33_v7, %v32_v5  ;;  %39 = vperm.xlu0 %172, %v36_v8   ;;  %v34_v10 = vld [vmem:[#allocation2 + $0x20] sm:$0xff]  ;;  %s195_s2 = scalar_lea.vmem %s124_s30, 128  ;;  %p200_p9 = scmp.lt.s32.totalorder %s124_s30, %s124_s30 }
  0x17   :  { %157 = vmatpush3.bf16.msra.mxu0 %v156_v6  ;;  %v162_v12 = vpack.c.bf16 %v35_v11, %v34_v10  ;;  %v29_v13 = vld [vmem:[%s279_s0] sm:$0xff]  ;;  %p196_p8 = scmp.ne.s32.totalorder %s124_s30, %s195_s2  ;;  %p201_p10 = scmp.lt.s32.totalorder %s195_s2, %s195_s2 }
  0x18   :  { %158 = vmatprep.subr.bf16.mxu0 %v224_v0 }
  0x19   :  { %p202_p11 = por %p201_p10, %p200_p9 }
  0x1b   :  { %160 = vmatpush3.bf16.msra.mxu0 %v159_v9  ;;  %p203_p12 = pnand %p202_p11, %p196_p8 }
  0x1c   :  { %161 = vmatprep.subr.bf16.mxu0 %v224_v0 }
  0x1f   :  { %163 = vmatpush3.bf16.msra.mxu0 %v162_v12 }
  0x22   :  { %153 = vmatmul.mubr.msk.f32.vlgmr.msra.gmra.mrb[0].mxu0 %vm42_vm1, %v29_v13 }
  0x95   :  { %v40_v14 = vpop.permute.xlu0 %39 }
  0xf5   :  { %v112_v15 = vpop.f32.mrb[0].mxu0 }
  0xf6   :  { %v113_v16 = vadd.f32 %v112_v15, %v40_v14  ;;  %v154_v17 = vpop.f32.mrb[1].mxu0 }
  0xf8   :  { %116 = vst [vmem:[#allocation5] sm:$0xff] %v113_v16 }
  0xf9   :  { %206 = shalt.err (!%p203_p12)
}
  0xfa   :  { %s207_s0 = scalar_lea.hbm %s282_s3, 128 }
  0xfb   :  { %p208_p13 = scmp.ne.s32.totalorder %s282_s3, %s207_s0  ;;  %p211_p0 = scmp.lt.u32.totalorder %s207_s0, %s282_s3 }
  0xfd   :  { %p213_p1 = pnand %p211_p0, %p208_p13 }
  0xff   :  { %216 = shalt.err (!%p213_p1)
}
 0x100   :  { %126 = dma.vmem_to_hbm [thread:$0]  %s124_s30, 128, %s282_s3, [#allocation4]  }
 0x101   :  { %219 = dma.done.wait [#allocation4], 128  }
 0x102   :  { %220 = vsyncadd [#allocation4], 4294967168 }
 0x103   :  { %130 = vsyncpa [#allocation3], 1 }
 0x104   :  { %131 = vsyncpa [#allocation4], 1 }

</bundles_post_ra>
